<compile_context>
chip_gen: v6e
topology: v6e:2x2x1
jax: 0.10.0
libtpu: 0.0.40
codegen_flags: <defaults>
</compile_context>

<pallas_src>
import math
import numpy as np

import jax
import jax.numpy as jnp
from jax import lax
from jax.experimental import pallas as pl
from jax.experimental.pallas import tpu as pltpu

# ----------------------------- config (AvaConfig) -----------------------------
HIDDEN_SIZE = 32
NUM_HEADS = 4
KV_HEADS = 2                       # GQA: kv_heads < num_heads -> repeat_interleave
HEAD_DIM = HIDDEN_SIZE // NUM_HEADS
GROUP = NUM_HEADS // KV_HEADS
ATTENTION_DROPOUT = 0.0            # nn.Dropout is identity in eval / p=0

BATCH = 2
SEQ = 8


# ------------------------------- Pallas kernel --------------------------------
def ava_attention_kernel(x_ref, wq_ref, wk_ref, wv_ref, wo_ref, out_ref):
    """Attention forward for the whole flattened batch in one invocation.

    x_ref  : (B*S, H)      flattened hidden states
    wq_ref : (nH, H, D)    per-head q_proj weights, 1/sqrt(D) pre-folded
    wk_ref : (kvH, H, D)   per-head k_proj weights
    wv_ref : (kvH, H, D)   per-head v_proj weights
    wo_ref : (nH, D, H)    per-head o_proj weights
    out_ref: (B*S, H)
    """
    x = x_ref[...]                                                   # (B*S, H)

    # Q/K/V projections over all B*S rows; per-head weights indexed on the
    # leading (major) axis -> no lane-axis slicing inside the kernel.
    q_heads = [jnp.dot(x, wq_ref[h], preferred_element_type=jnp.float32)
               for h in range(NUM_HEADS)]                            # each (B*S, D)
    k_heads = [jnp.dot(x, wk_ref[g], preferred_element_type=jnp.float32)
               for g in range(KV_HEADS)]                             # each (B*S, D)
    v_heads = [jnp.dot(x, wv_ref[g], preferred_element_type=jnp.float32)
               for g in range(KV_HEADS)]                             # each (B*S, D)

    # Contract dim 1 of both operands: q @ k^T without materializing k^T.
    dn = (((1,), (1,)), ((), ()))

    for b in range(BATCH):                 # static, fully unrolled (B = 2)
        lo, hi = b * SEQ, (b + 1) * SEQ    # sublane-aligned row window
        acc = jnp.zeros((SEQ, HIDDEN_SIZE), jnp.float32)
        for h in range(NUM_HEADS):         # static, fully unrolled (nH = 4)
            g = h // GROUP                 # repeat_interleave (GQA) semantics
            qh = q_heads[h][lo:hi]         # (S, D)
            kh = k_heads[g][lo:hi]         # (S, D)
            vh = v_heads[g][lo:hi]         # (S, D)

            # softmax in float32 (matches F.softmax(..., dtype=torch.float32));
            # the 1/sqrt(D) scale is already folded into wq.
            scores = lax.dot_general(qh, kh, dn,
                                     preferred_element_type=jnp.float32)  # (S, S)
            scores = scores - jnp.max(scores, axis=-1, keepdims=True)
            p = jnp.exp(scores)
            p = p * pl.reciprocal(jnp.sum(p, axis=-1, keepdims=True), approx=True)
            # attention_dropout: identity (eval mode / p = 0)

            ctx = jnp.dot(p, vh, preferred_element_type=jnp.float32)       # (S, D)
            # Per-head output projection accumulated in f32 -> no lane concat.
            acc = acc + jnp.dot(ctx, wo_ref[h],
                                preferred_element_type=jnp.float32)        # (S, H)

        out_ref[lo:hi, :] = acc.astype(out_ref.dtype)


def ava_attention(hidden_states, wq_t, wk_t, wv_t, wo_t):
    """hidden_states: (B, S, H) float32. Weights pre-transposed to (in, out)."""
    B, S, H = hidden_states.shape
    D, nH, kvH = HEAD_DIM, NUM_HEADS, KV_HEADS

    # Host-side layout prep (free): flatten rows, split weights per head,
    # fold the 1/sqrt(D) softmax scale into wq.
    x2d = hidden_states.reshape(B * S, H)
    scale = 1.0 / math.sqrt(D)
    wq_s = (wq_t * scale).reshape(H, nH, D).transpose(1, 0, 2)   # (nH, H, D)
    wk_s = wk_t.reshape(H, kvH, D).transpose(1, 0, 2)            # (kvH, H, D)
    wv_s = wv_t.reshape(H, kvH, D).transpose(1, 0, 2)            # (kvH, H, D)
    wo_s = wo_t.reshape(nH, D, H)                                # (nH, D, H)

    vmem_spec = pl.BlockSpec(memory_space=pltpu.MemorySpace.VMEM)
    out2d = pl.pallas_call(
        ava_attention_kernel,
        out_shape=jax.ShapeDtypeStruct((B * S, H), hidden_states.dtype),
        in_specs=[vmem_spec] * 5,
        out_specs=vmem_spec,
    )(x2d, wq_s, wk_s, wv_s, wo_s)
    return out2d.reshape(B, S, H)


# ----------------------------- pure-JAX reference ------------------------------
def ava_attention_ref(x, wq_t, wk_t, wv_t, wo_t):
    B, S, H = x.shape
    q = (x @ wq_t).reshape(B, S, NUM_HEADS, HEAD_DIM).transpose(0, 2, 1, 3)
    k = (x @ wk_t).reshape(B, S, KV_HEADS, HEAD_DIM).transpose(0, 2, 1, 3)
    v = (x @ wv_t).reshape(B, S, KV_HEADS, HEAD_DIM).transpose(0, 2, 1, 3)
    rep = NUM_HEADS // KV_HEADS
    k = jnp.repeat(k, rep, axis=1)
    v = jnp.repeat(v, rep, axis=1)
    scores = jnp.einsum("bhqd,bhkd->bhqk", q, k) / math.sqrt(HEAD_DIM)
    probs = jax.nn.softmax(scores.astype(jnp.float32), axis=-1).astype(q.dtype)
    ctx = jnp.einsum("bhqk,bhkd->bhqd", probs, v)
    ctx = ctx.transpose(0, 2, 1, 3).reshape(B, S, NUM_HEADS * HEAD_DIM)
    return ctx @ wo_t


# ------------------------------------ main -------------------------------------
if __name__ == "__main__":
    key = jax.random.PRNGKey(0)
    k_x, k_q, k_k, k_v, k_o = jax.random.split(key, 5)

    x = jax.random.normal(k_x, (BATCH, SEQ, HIDDEN_SIZE), dtype=jnp.float32)

    # nn.Linear(in, out, bias=False).weight has shape (out, in); store transposed.
    def init_linear_t(k, in_f, out_f):
        bound = 1.0 / math.sqrt(in_f)
        w = jax.random.uniform(k, (out_f, in_f), jnp.float32, -bound, bound)
        return w.T  # (in, out)

    wq_t = init_linear_t(k_q, HIDDEN_SIZE, NUM_HEADS * HEAD_DIM)
    wk_t = init_linear_t(k_k, HIDDEN_SIZE, KV_HEADS * HEAD_DIM)
    wv_t = init_linear_t(k_v, HIDDEN_SIZE, KV_HEADS * HEAD_DIM)
    wo_t = init_linear_t(k_o, NUM_HEADS * HEAD_DIM, HIDDEN_SIZE)

    out = ava_attention(x, wq_t, wk_t, wv_t, wo_t)
    out = jax.block_until_ready(out)

    ref = ava_attention_ref(x, wq_t, wk_t, wv_t, wo_t)
    # Tolerance relaxed slightly because the softmax normalizer uses the EUP
    # approximate reciprocal (pl.reciprocal(..., approx=True)).
    np.testing.assert_allclose(np.asarray(out), np.asarray(ref), rtol=2e-3, atol=2e-3)

    # TODO(synk): attention_mask / rotary_emb / past_key_value / sliding-window
    # variants are not exercised in the default forward (all default to None).
    print("KERNEL_OK")
</pallas_src>

<mosaic_0001>
module attributes {stable_mosaic.version = 11 : i64} {
  func.func @ava_attention_kernel(%arg0: memref<16x32xf32, #tpu.memory_space<vmem>>, %arg1: memref<4x32x8xf32, #tpu.memory_space<vmem>>, %arg2: memref<2x32x8xf32, #tpu.memory_space<vmem>>, %arg3: memref<2x32x8xf32, #tpu.memory_space<vmem>>, %arg4: memref<4x8x32xf32, #tpu.memory_space<vmem>>, %arg5: memref<16x32xf32, #tpu.memory_space<vmem>>) attributes {dimension_semantics = [], scalar_prefetch = 0 : i64, scratch_operands = 0 : i64, tpu.core_type = #tpu.core_type<tc>} {
    %c0 = arith.constant 0 : index
    %c0_0 = arith.constant 0 : index
    %0 = vector.load %arg0[%c0, %c0_0] : memref<16x32xf32, #tpu.memory_space<vmem>>, vector<16x32xf32>
    %c0_1 = arith.constant 0 : index
    %c0_2 = arith.constant 0 : index
    %c0_3 = arith.constant 0 : index
    %1 = vector.load %arg1[%c0_1, %c0_2, %c0_3] : memref<4x32x8xf32, #tpu.memory_space<vmem>>, vector<1x32x8xf32>
    %2 = vector.shape_cast %1 : vector<1x32x8xf32> to vector<32x8xf32>
    %cst = arith.constant dense<0.000000e+00> : vector<16x8xf32>
    %3 = tpu.matmul %0, %2, %cst {dimension_numbers = #tpu.dot_dimension_numbers<[1], [0], [0], [1], [0, 0, 1, 1], [], []>} : vector<16x32xf32>, vector<32x8xf32>, vector<16x8xf32> -> vector<16x8xf32>
    %c1 = arith.constant 1 : index
    %c0_4 = arith.constant 0 : index
    %c0_5 = arith.constant 0 : index
    %4 = vector.load %arg1[%c1, %c0_4, %c0_5] : memref<4x32x8xf32, #tpu.memory_space<vmem>>, vector<1x32x8xf32>
    %5 = vector.shape_cast %4 : vector<1x32x8xf32> to vector<32x8xf32>
    %cst_6 = arith.constant dense<0.000000e+00> : vector<16x8xf32>
    %6 = tpu.matmul %0, %5, %cst_6 {dimension_numbers = #tpu.dot_dimension_numbers<[1], [0], [0], [1], [0, 0, 1, 1], [], []>} : vector<16x32xf32>, vector<32x8xf32>, vector<16x8xf32> -> vector<16x8xf32>
    %c2 = arith.constant 2 : index
    %c0_7 = arith.constant 0 : index
    %c0_8 = arith.constant 0 : index
    %7 = vector.load %arg1[%c2, %c0_7, %c0_8] : memref<4x32x8xf32, #tpu.memory_space<vmem>>, vector<1x32x8xf32>
    %8 = vector.shape_cast %7 : vector<1x32x8xf32> to vector<32x8xf32>
    %cst_9 = arith.constant dense<0.000000e+00> : vector<16x8xf32>
    %9 = tpu.matmul %0, %8, %cst_9 {dimension_numbers = #tpu.dot_dimension_numbers<[1], [0], [0], [1], [0, 0, 1, 1], [], []>} : vector<16x32xf32>, vector<32x8xf32>, vector<16x8xf32> -> vector<16x8xf32>
    %c3 = arith.constant 3 : index
    %c0_10 = arith.constant 0 : index
    %c0_11 = arith.constant 0 : index
    %10 = vector.load %arg1[%c3, %c0_10, %c0_11] : memref<4x32x8xf32, #tpu.memory_space<vmem>>, vector<1x32x8xf32>
    %11 = vector.shape_cast %10 : vector<1x32x8xf32> to vector<32x8xf32>
    %cst_12 = arith.constant dense<0.000000e+00> : vector<16x8xf32>
    %12 = tpu.matmul %0, %11, %cst_12 {dimension_numbers = #tpu.dot_dimension_numbers<[1], [0], [0], [1], [0, 0, 1, 1], [], []>} : vector<16x32xf32>, vector<32x8xf32>, vector<16x8xf32> -> vector<16x8xf32>
    %c0_13 = arith.constant 0 : index
    %c0_14 = arith.constant 0 : index
    %c0_15 = arith.constant 0 : index
    %13 = vector.load %arg2[%c0_13, %c0_14, %c0_15] : memref<2x32x8xf32, #tpu.memory_space<vmem>>, vector<1x32x8xf32>
    %14 = vector.shape_cast %13 : vector<1x32x8xf32> to vector<32x8xf32>
    %cst_16 = arith.constant dense<0.000000e+00> : vector<16x8xf32>
    %15 = tpu.matmul %0, %14, %cst_16 {dimension_numbers = #tpu.dot_dimension_numbers<[1], [0], [0], [1], [0, 0, 1, 1], [], []>} : vector<16x32xf32>, vector<32x8xf32>, vector<16x8xf32> -> vector<16x8xf32>
    %c1_17 = arith.constant 1 : index
    %c0_18 = arith.constant 0 : index
    %c0_19 = arith.constant 0 : index
    %16 = vector.load %arg2[%c1_17, %c0_18, %c0_19] : memref<2x32x8xf32, #tpu.memory_space<vmem>>, vector<1x32x8xf32>
    %17 = vector.shape_cast %16 : vector<1x32x8xf32> to vector<32x8xf32>
    %cst_20 = arith.constant dense<0.000000e+00> : vector<16x8xf32>
    %18 = tpu.matmul %0, %17, %cst_20 {dimension_numbers = #tpu.dot_dimension_numbers<[1], [0], [0], [1], [0, 0, 1, 1], [], []>} : vector<16x32xf32>, vector<32x8xf32>, vector<16x8xf32> -> vector<16x8xf32>
    %c0_21 = arith.constant 0 : index
    %c0_22 = arith.constant 0 : index
    %c0_23 = arith.constant 0 : index
    %19 = vector.load %arg3[%c0_21, %c0_22, %c0_23] : memref<2x32x8xf32, #tpu.memory_space<vmem>>, vector<1x32x8xf32>
    %20 = vector.shape_cast %19 : vector<1x32x8xf32> to vector<32x8xf32>
    %cst_24 = arith.constant dense<0.000000e+00> : vector<16x8xf32>
    %21 = tpu.matmul %0, %20, %cst_24 {dimension_numbers = #tpu.dot_dimension_numbers<[1], [0], [0], [1], [0, 0, 1, 1], [], []>} : vector<16x32xf32>, vector<32x8xf32>, vector<16x8xf32> -> vector<16x8xf32>
    %c1_25 = arith.constant 1 : index
    %c0_26 = arith.constant 0 : index
    %c0_27 = arith.constant 0 : index
    %22 = vector.load %arg3[%c1_25, %c0_26, %c0_27] : memref<2x32x8xf32, #tpu.memory_space<vmem>>, vector<1x32x8xf32>
    %23 = vector.shape_cast %22 : vector<1x32x8xf32> to vector<32x8xf32>
    %cst_28 = arith.constant dense<0.000000e+00> : vector<16x8xf32>
    %24 = tpu.matmul %0, %23, %cst_28 {dimension_numbers = #tpu.dot_dimension_numbers<[1], [0], [0], [1], [0, 0, 1, 1], [], []>} : vector<16x32xf32>, vector<32x8xf32>, vector<16x8xf32> -> vector<16x8xf32>
    %cst_29 = arith.constant 0.000000e+00 : f32
    %25 = vector.broadcast %cst_29 : f32 to vector<8x32xf32>
    %26 = vector.extract_strided_slice %3 {offsets = [0, 0], sizes = [8, 8], strides = [1, 1]} : vector<16x8xf32> to vector<8x8xf32>
    %27 = vector.extract_strided_slice %15 {offsets = [0, 0], sizes = [8, 8], strides = [1, 1]} : vector<16x8xf32> to vector<8x8xf32>
    %28 = vector.extract_strided_slice %21 {offsets = [0, 0], sizes = [8, 8], strides = [1, 1]} : vector<16x8xf32> to vector<8x8xf32>
    %cst_30 = arith.constant dense<0.000000e+00> : vector<8x8xf32>
    %29 = tpu.matmul %26, %27, %cst_30 {dimension_numbers = #tpu.dot_dimension_numbers<[1], [1], [0], [0], [0, 0, 1, 0], [], []>} : vector<8x8xf32>, vector<8x8xf32>, vector<8x8xf32> -> vector<8x8xf32>
    %cst_31 = arith.constant dense<0xFF800000> : vector<8xf32>
    %30 = vector.multi_reduction <maximumf>, %29, %cst_31 [1] : vector<8x8xf32> to vector<8xf32>
    %31 = vector.shape_cast %30 : vector<8xf32> to vector<8x1xf32>
    %32 = vector.broadcast %31 : vector<8x1xf32> to vector<8x8xf32>
    %33 = arith.subf %29, %32 : vector<8x8xf32>
    %34 = math.exp %33 : vector<8x8xf32>
    %cst_32 = arith.constant dense<0.000000e+00> : vector<8xf32>
    %35 = vector.multi_reduction <add>, %34, %cst_32 [1] : vector<8x8xf32> to vector<8xf32>
    %36 = vector.shape_cast %35 : vector<8xf32> to vector<8x1xf32>
    %37 = tpu.reciprocal %36 {approx = true} : vector<8x1xf32> -> vector<8x1xf32>
    %38 = vector.broadcast %37 : vector<8x1xf32> to vector<8x8xf32>
    %39 = arith.mulf %34, %38 : vector<8x8xf32>
    %cst_33 = arith.constant dense<0.000000e+00> : vector<8x8xf32>
    %40 = tpu.matmul %39, %28, %cst_33 {dimension_numbers = #tpu.dot_dimension_numbers<[1], [0], [0], [1], [0, 0, 1, 1], [], []>} : vector<8x8xf32>, vector<8x8xf32>, vector<8x8xf32> -> vector<8x8xf32>
    %c0_34 = arith.constant 0 : index
    %c0_35 = arith.constant 0 : index
    %c0_36 = arith.constant 0 : index
    %41 = vector.load %arg4[%c0_34, %c0_35, %c0_36] : memref<4x8x32xf32, #tpu.memory_space<vmem>>, vector<1x8x32xf32>
    %42 = vector.shape_cast %41 : vector<1x8x32xf32> to vector<8x32xf32>
    %cst_37 = arith.constant dense<0.000000e+00> : vector<8x32xf32>
    %43 = tpu.matmul %40, %42, %cst_37 {dimension_numbers = #tpu.dot_dimension_numbers<[1], [0], [0], [1], [0, 0, 1, 1], [], []>} : vector<8x8xf32>, vector<8x32xf32>, vector<8x32xf32> -> vector<8x32xf32>
    %44 = arith.addf %25, %43 : vector<8x32xf32>
    %45 = vector.extract_strided_slice %6 {offsets = [0, 0], sizes = [8, 8], strides = [1, 1]} : vector<16x8xf32> to vector<8x8xf32>
    %46 = vector.extract_strided_slice %15 {offsets = [0, 0], sizes = [8, 8], strides = [1, 1]} : vector<16x8xf32> to vector<8x8xf32>
    %47 = vector.extract_strided_slice %21 {offsets = [0, 0], sizes = [8, 8], strides = [1, 1]} : vector<16x8xf32> to vector<8x8xf32>
    %cst_38 = arith.constant dense<0.000000e+00> : vector<8x8xf32>
    %48 = tpu.matmul %45, %46, %cst_38 {dimension_numbers = #tpu.dot_dimension_numbers<[1], [1], [0], [0], [0, 0, 1, 0], [], []>} : vector<8x8xf32>, vector<8x8xf32>, vector<8x8xf32> -> vector<8x8xf32>
    %cst_39 = arith.constant dense<0xFF800000> : vector<8xf32>
    %49 = vector.multi_reduction <maximumf>, %48, %cst_39 [1] : vector<8x8xf32> to vector<8xf32>
    %50 = vector.shape_cast %49 : vector<8xf32> to vector<8x1xf32>
    %51 = vector.broadcast %50 : vector<8x1xf32> to vector<8x8xf32>
    %52 = arith.subf %48, %51 : vector<8x8xf32>
    %53 = math.exp %52 : vector<8x8xf32>
    %cst_40 = arith.constant dense<0.000000e+00> : vector<8xf32>
    %54 = vector.multi_reduction <add>, %53, %cst_40 [1] : vector<8x8xf32> to vector<8xf32>
    %55 = vector.shape_cast %54 : vector<8xf32> to vector<8x1xf32>
    %56 = tpu.reciprocal %55 {approx = true} : vector<8x1xf32> -> vector<8x1xf32>
    %57 = vector.broadcast %56 : vector<8x1xf32> to vector<8x8xf32>
    %58 = arith.mulf %53, %57 : vector<8x8xf32>
    %cst_41 = arith.constant dense<0.000000e+00> : vector<8x8xf32>
    %59 = tpu.matmul %58, %47, %cst_41 {dimension_numbers = #tpu.dot_dimension_numbers<[1], [0], [0], [1], [0, 0, 1, 1], [], []>} : vector<8x8xf32>, vector<8x8xf32>, vector<8x8xf32> -> vector<8x8xf32>
    %c1_42 = arith.constant 1 : index
    %c0_43 = arith.constant 0 : index
    %c0_44 = arith.constant 0 : index
    %60 = vector.load %arg4[%c1_42, %c0_43, %c0_44] : memref<4x8x32xf32, #tpu.memory_space<vmem>>, vector<1x8x32xf32>
    %61 = vector.shape_cast %60 : vector<1x8x32xf32> to vector<8x32xf32>
    %cst_45 = arith.constant dense<0.000000e+00> : vector<8x32xf32>
    %62 = tpu.matmul %59, %61, %cst_45 {dimension_numbers = #tpu.dot_dimension_numbers<[1], [0], [0], [1], [0, 0, 1, 1], [], []>} : vector<8x8xf32>, vector<8x32xf32>, vector<8x32xf32> -> vector<8x32xf32>
    %63 = arith.addf %44, %62 : vector<8x32xf32>
    %64 = vector.extract_strided_slice %9 {offsets = [0, 0], sizes = [8, 8], strides = [1, 1]} : vector<16x8xf32> to vector<8x8xf32>
    %65 = vector.extract_strided_slice %18 {offsets = [0, 0], sizes = [8, 8], strides = [1, 1]} : vector<16x8xf32> to vector<8x8xf32>
    %66 = vector.extract_strided_slice %24 {offsets = [0, 0], sizes = [8, 8], strides = [1, 1]} : vector<16x8xf32> to vector<8x8xf32>
    %cst_46 = arith.constant dense<0.000000e+00> : vector<8x8xf32>
    %67 = tpu.matmul %64, %65, %cst_46 {dimension_numbers = #tpu.dot_dimension_numbers<[1], [1], [0], [0], [0, 0, 1, 0], [], []>} : vector<8x8xf32>, vector<8x8xf32>, vector<8x8xf32> -> vector<8x8xf32>
    %cst_47 = arith.constant dense<0xFF800000> : vector<8xf32>
    %68 = vector.multi_reduction <maximumf>, %67, %cst_47 [1] : vector<8x8xf32> to vector<8xf32>
    %69 = vector.shape_cast %68 : vector<8xf32> to vector<8x1xf32>
    %70 = vector.broadcast %69 : vector<8x1xf32> to vector<8x8xf32>
    %71 = arith.subf %67, %70 : vector<8x8xf32>
    %72 = math.exp %71 : vector<8x8xf32>
    %cst_48 = arith.constant dense<0.000000e+00> : vector<8xf32>
    %73 = vector.multi_reduction <add>, %72, %cst_48 [1] : vector<8x8xf32> to vector<8xf32>
    %74 = vector.shape_cast %73 : vector<8xf32> to vector<8x1xf32>
    %75 = tpu.reciprocal %74 {approx = true} : vector<8x1xf32> -> vector<8x1xf32>
    %76 = vector.broadcast %75 : vector<8x1xf32> to vector<8x8xf32>
    %77 = arith.mulf %72, %76 : vector<8x8xf32>
    %cst_49 = arith.constant dense<0.000000e+00> : vector<8x8xf32>
    %78 = tpu.matmul %77, %66, %cst_49 {dimension_numbers = #tpu.dot_dimension_numbers<[1], [0], [0], [1], [0, 0, 1, 1], [], []>} : vector<8x8xf32>, vector<8x8xf32>, vector<8x8xf32> -> vector<8x8xf32>
    %c2_50 = arith.constant 2 : index
    %c0_51 = arith.constant 0 : index
    %c0_52 = arith.constant 0 : index
    %79 = vector.load %arg4[%c2_50, %c0_51, %c0_52] : memref<4x8x32xf32, #tpu.memory_space<vmem>>, vector<1x8x32xf32>
    %80 = vector.shape_cast %79 : vector<1x8x32xf32> to vector<8x32xf32>
    %cst_53 = arith.constant dense<0.000000e+00> : vector<8x32xf32>
    %81 = tpu.matmul %78, %80, %cst_53 {dimension_numbers = #tpu.dot_dimension_numbers<[1], [0], [0], [1], [0, 0, 1, 1], [], []>} : vector<8x8xf32>, vector<8x32xf32>, vector<8x32xf32> -> vector<8x32xf32>
    %82 = arith.addf %63, %81 : vector<8x32xf32>
    %83 = vector.extract_strided_slice %12 {offsets = [0, 0], sizes = [8, 8], strides = [1, 1]} : vector<16x8xf32> to vector<8x8xf32>
    %84 = vector.extract_strided_slice %18 {offsets = [0, 0], sizes = [8, 8], strides = [1, 1]} : vector<16x8xf32> to vector<8x8xf32>
    %85 = vector.extract_strided_slice %24 {offsets = [0, 0], sizes = [8, 8], strides = [1, 1]} : vector<16x8xf32> to vector<8x8xf32>
    %cst_54 = arith.constant dense<0.000000e+00> : vector<8x8xf32>
    %86 = tpu.matmul %83, %84, %cst_54 {dimension_numbers = #tpu.dot_dimension_numbers<[1], [1], [0], [0], [0, 0, 1, 0], [], []>} : vector<8x8xf32>, vector<8x8xf32>, vector<8x8xf32> -> vector<8x8xf32>
    %cst_55 = arith.constant dense<0xFF800000> : vector<8xf32>
    %87 = vector.multi_reduction <maximumf>, %86, %cst_55 [1] : vector<8x8xf32> to vector<8xf32>
    %88 = vector.shape_cast %87 : vector<8xf32> to vector<8x1xf32>
    %89 = vector.broadcast %88 : vector<8x1xf32> to vector<8x8xf32>
    %90 = arith.subf %86, %89 : vector<8x8xf32>
    %91 = math.exp %90 : vector<8x8xf32>
    %cst_56 = arith.constant dense<0.000000e+00> : vector<8xf32>
    %92 = vector.multi_reduction <add>, %91, %cst_56 [1] : vector<8x8xf32> to vector<8xf32>
    %93 = vector.shape_cast %92 : vector<8xf32> to vector<8x1xf32>
    %94 = tpu.reciprocal %93 {approx = true} : vector<8x1xf32> -> vector<8x1xf32>
    %95 = vector.broadcast %94 : vector<8x1xf32> to vector<8x8xf32>
    %96 = arith.mulf %91, %95 : vector<8x8xf32>
    %cst_57 = arith.constant dense<0.000000e+00> : vector<8x8xf32>
    %97 = tpu.matmul %96, %85, %cst_57 {dimension_numbers = #tpu.dot_dimension_numbers<[1], [0], [0], [1], [0, 0, 1, 1], [], []>} : vector<8x8xf32>, vector<8x8xf32>, vector<8x8xf32> -> vector<8x8xf32>
    %c3_58 = arith.constant 3 : index
    %c0_59 = arith.constant 0 : index
    %c0_60 = arith.constant 0 : index
    %98 = vector.load %arg4[%c3_58, %c0_59, %c0_60] : memref<4x8x32xf32, #tpu.memory_space<vmem>>, vector<1x8x32xf32>
    %99 = vector.shape_cast %98 : vector<1x8x32xf32> to vector<8x32xf32>
    %cst_61 = arith.constant dense<0.000000e+00> : vector<8x32xf32>
    %100 = tpu.matmul %97, %99, %cst_61 {dimension_numbers = #tpu.dot_dimension_numbers<[1], [0], [0], [1], [0, 0, 1, 1], [], []>} : vector<8x8xf32>, vector<8x32xf32>, vector<8x32xf32> -> vector<8x32xf32>
    %101 = arith.addf %82, %100 : vector<8x32xf32>
    %c0_62 = arith.constant 0 : index
    %c0_63 = arith.constant 0 : index
    %102 = vector.load %arg5[%c0_62, %c0_63] : memref<16x32xf32, #tpu.memory_space<vmem>>, vector<8x32xf32>
    tpu.vector_store %arg5[%c0_62, %c0_63], %101 {strides = array<i32>} : memref<16x32xf32, #tpu.memory_space<vmem>>, vector<8x32xf32>,
    %cst_64 = arith.constant 0.000000e+00 : f32
    %103 = vector.broadcast %cst_64 : f32 to vector<8x32xf32>
    %104 = vector.extract_strided_slice %3 {offsets = [8, 0], sizes = [8, 8], strides = [1, 1]} : vector<16x8xf32> to vector<8x8xf32>
    %105 = vector.extract_strided_slice %15 {offsets = [8, 0], sizes = [8, 8], strides = [1, 1]} : vector<16x8xf32> to vector<8x8xf32>
    %106 = vector.extract_strided_slice %21 {offsets = [8, 0], sizes = [8, 8], strides = [1, 1]} : vector<16x8xf32> to vector<8x8xf32>
    %cst_65 = arith.constant dense<0.000000e+00> : vector<8x8xf32>
    %107 = tpu.matmul %104, %105, %cst_65 {dimension_numbers = #tpu.dot_dimension_numbers<[1], [1], [0], [0], [0, 0, 1, 0], [], []>} : vector<8x8xf32>, vector<8x8xf32>, vector<8x8xf32> -> vector<8x8xf32>
    %cst_66 = arith.constant dense<0xFF800000> : vector<8xf32>
    %108 = vector.multi_reduction <maximumf>, %107, %cst_66 [1] : vector<8x8xf32> to vector<8xf32>
    %109 = vector.shape_cast %108 : vector<8xf32> to vector<8x1xf32>
    %110 = vector.broadcast %109 : vector<8x1xf32> to vector<8x8xf32>
    %111 = arith.subf %107, %110 : vector<8x8xf32>
    %112 = math.exp %111 : vector<8x8xf32>
    %cst_67 = arith.constant dense<0.000000e+00> : vector<8xf32>
    %113 = vector.multi_reduction <add>, %112, %cst_67 [1] : vector<8x8xf32> to vector<8xf32>
    %114 = vector.shape_cast %113 : vector<8xf32> to vector<8x1xf32>
    %115 = tpu.reciprocal %114 {approx = true} : vector<8x1xf32> -> vector<8x1xf32>
    %116 = vector.broadcast %115 : vector<8x1xf32> to vector<8x8xf32>
    %117 = arith.mulf %112, %116 : vector<8x8xf32>
    %cst_68 = arith.constant dense<0.000000e+00> : vector<8x8xf32>
    %118 = tpu.matmul %117, %106, %cst_68 {dimension_numbers = #tpu.dot_dimension_numbers<[1], [0], [0], [1], [0, 0, 1, 1], [], []>} : vector<8x8xf32>, vector<8x8xf32>, vector<8x8xf32> -> vector<8x8xf32>
    %c0_69 = arith.constant 0 : index
    %c0_70 = arith.constant 0 : index
    %c0_71 = arith.constant 0 : index
    %119 = vector.load %arg4[%c0_69, %c0_70, %c0_71] : memref<4x8x32xf32, #tpu.memory_space<vmem>>, vector<1x8x32xf32>
    %120 = vector.shape_cast %119 : vector<1x8x32xf32> to vector<8x32xf32>
    %cst_72 = arith.constant dense<0.000000e+00> : vector<8x32xf32>
    %121 = tpu.matmul %118, %120, %cst_72 {dimension_numbers = #tpu.dot_dimension_numbers<[1], [0], [0], [1], [0, 0, 1, 1], [], []>} : vector<8x8xf32>, vector<8x32xf32>, vector<8x32xf32> -> vector<8x32xf32>
    %122 = arith.addf %103, %121 : vector<8x32xf32>
    %123 = vector.extract_strided_slice %6 {offsets = [8, 0], sizes = [8, 8], strides = [1, 1]} : vector<16x8xf32> to vector<8x8xf32>
    %124 = vector.extract_strided_slice %15 {offsets = [8, 0], sizes = [8, 8], strides = [1, 1]} : vector<16x8xf32> to vector<8x8xf32>
    %125 = vector.extract_strided_slice %21 {offsets = [8, 0], sizes = [8, 8], strides = [1, 1]} : vector<16x8xf32> to vector<8x8xf32>
    %cst_73 = arith.constant dense<0.000000e+00> : vector<8x8xf32>
    %126 = tpu.matmul %123, %124, %cst_73 {dimension_numbers = #tpu.dot_dimension_numbers<[1], [1], [0], [0], [0, 0, 1, 0], [], []>} : vector<8x8xf32>, vector<8x8xf32>, vector<8x8xf32> -> vector<8x8xf32>
    %cst_74 = arith.constant dense<0xFF800000> : vector<8xf32>
    %127 = vector.multi_reduction <maximumf>, %126, %cst_74 [1] : vector<8x8xf32> to vector<8xf32>
    %128 = vector.shape_cast %127 : vector<8xf32> to vector<8x1xf32>
    %129 = vector.broadcast %128 : vector<8x1xf32> to vector<8x8xf32>
    %130 = arith.subf %126, %129 : vector<8x8xf32>
    %131 = math.exp %130 : vector<8x8xf32>
    %cst_75 = arith.constant dense<0.000000e+00> : vector<8xf32>
    %132 = vector.multi_reduction <add>, %131, %cst_75 [1] : vector<8x8xf32> to vector<8xf32>
    %133 = vector.shape_cast %132 : vector<8xf32> to vector<8x1xf32>
    %134 = tpu.reciprocal %133 {approx = true} : vector<8x1xf32> -> vector<8x1xf32>
    %135 = vector.broadcast %134 : vector<8x1xf32> to vector<8x8xf32>
    %136 = arith.mulf %131, %135 : vector<8x8xf32>
    %cst_76 = arith.constant dense<0.000000e+00> : vector<8x8xf32>
    %137 = tpu.matmul %136, %125, %cst_76 {dimension_numbers = #tpu.dot_dimension_numbers<[1], [0], [0], [1], [0, 0, 1, 1], [], []>} : vector<8x8xf32>, vector<8x8xf32>, vector<8x8xf32> -> vector<8x8xf32>
    %c1_77 = arith.constant 1 : index
    %c0_78 = arith.constant 0 : index
    %c0_79 = arith.constant 0 : index
    %138 = vector.load %arg4[%c1_77, %c0_78, %c0_79] : memref<4x8x32xf32, #tpu.memory_space<vmem>>, vector<1x8x32xf32>
    %139 = vector.shape_cast %138 : vector<1x8x32xf32> to vector<8x32xf32>
    %cst_80 = arith.constant dense<0.000000e+00> : vector<8x32xf32>
    %140 = tpu.matmul %137, %139, %cst_80 {dimension_numbers = #tpu.dot_dimension_numbers<[1], [0], [0], [1], [0, 0, 1, 1], [], []>} : vector<8x8xf32>, vector<8x32xf32>, vector<8x32xf32> -> vector<8x32xf32>
    %141 = arith.addf %122, %140 : vector<8x32xf32>
    %142 = vector.extract_strided_slice %9 {offsets = [8, 0], sizes = [8, 8], strides = [1, 1]} : vector<16x8xf32> to vector<8x8xf32>
    %143 = vector.extract_strided_slice %18 {offsets = [8, 0], sizes = [8, 8], strides = [1, 1]} : vector<16x8xf32> to vector<8x8xf32>
    %144 = vector.extract_strided_slice %24 {offsets = [8, 0], sizes = [8, 8], strides = [1, 1]} : vector<16x8xf32> to vector<8x8xf32>
    %cst_81 = arith.constant dense<0.000000e+00> : vector<8x8xf32>
    %145 = tpu.matmul %142, %143, %cst_81 {dimension_numbers = #tpu.dot_dimension_numbers<[1], [1], [0], [0], [0, 0, 1, 0], [], []>} : vector<8x8xf32>, vector<8x8xf32>, vector<8x8xf32> -> vector<8x8xf32>
    %cst_82 = arith.constant dense<0xFF800000> : vector<8xf32>
    %146 = vector.multi_reduction <maximumf>, %145, %cst_82 [1] : vector<8x8xf32> to vector<8xf32>
    %147 = vector.shape_cast %146 : vector<8xf32> to vector<8x1xf32>
    %148 = vector.broadcast %147 : vector<8x1xf32> to vector<8x8xf32>
    %149 = arith.subf %145, %148 : vector<8x8xf32>
    %150 = math.exp %149 : vector<8x8xf32>
    %cst_83 = arith.constant dense<0.000000e+00> : vector<8xf32>
    %151 = vector.multi_reduction <add>, %150, %cst_83 [1] : vector<8x8xf32> to vector<8xf32>
    %152 = vector.shape_cast %151 : vector<8xf32> to vector<8x1xf32>
    %153 = tpu.reciprocal %152 {approx = true} : vector<8x1xf32> -> vector<8x1xf32>
    %154 = vector.broadcast %153 : vector<8x1xf32> to vector<8x8xf32>
    %155 = arith.mulf %150, %154 : vector<8x8xf32>
    %cst_84 = arith.constant dense<0.000000e+00> : vector<8x8xf32>
    %156 = tpu.matmul %155, %144, %cst_84 {dimension_numbers = #tpu.dot_dimension_numbers<[1], [0], [0], [1], [0, 0, 1, 1], [], []>} : vector<8x8xf32>, vector<8x8xf32>, vector<8x8xf32> -> vector<8x8xf32>
    %c2_85 = arith.constant 2 : index
    %c0_86 = arith.constant 0 : index
    %c0_87 = arith.constant 0 : index
    %157 = vector.load %arg4[%c2_85, %c0_86, %c0_87] : memref<4x8x32xf32, #tpu.memory_space<vmem>>, vector<1x8x32xf32>
    %158 = vector.shape_cast %157 : vector<1x8x32xf32> to vector<8x32xf32>
    %cst_88 = arith.constant dense<0.000000e+00> : vector<8x32xf32>
    %159 = tpu.matmul %156, %158, %cst_88 {dimension_numbers = #tpu.dot_dimension_numbers<[1], [0], [0], [1], [0, 0, 1, 1], [], []>} : vector<8x8xf32>, vector<8x32xf32>, vector<8x32xf32> -> vector<8x32xf32>
    %160 = arith.addf %141, %159 : vector<8x32xf32>
    %161 = vector.extract_strided_slice %12 {offsets = [8, 0], sizes = [8, 8], strides = [1, 1]} : vector<16x8xf32> to vector<8x8xf32>
    %162 = vector.extract_strided_slice %18 {offsets = [8, 0], sizes = [8, 8], strides = [1, 1]} : vector<16x8xf32> to vector<8x8xf32>
    %163 = vector.extract_strided_slice %24 {offsets = [8, 0], sizes = [8, 8], strides = [1, 1]} : vector<16x8xf32> to vector<8x8xf32>
    %cst_89 = arith.constant dense<0.000000e+00> : vector<8x8xf32>
    %164 = tpu.matmul %161, %162, %cst_89 {dimension_numbers = #tpu.dot_dimension_numbers<[1], [1], [0], [0], [0, 0, 1, 0], [], []>} : vector<8x8xf32>, vector<8x8xf32>, vector<8x8xf32> -> vector<8x8xf32>
    %cst_90 = arith.constant dense<0xFF800000> : vector<8xf32>
    %165 = vector.multi_reduction <maximumf>, %164, %cst_90 [1] : vector<8x8xf32> to vector<8xf32>
    %166 = vector.shape_cast %165 : vector<8xf32> to vector<8x1xf32>
    %167 = vector.broadcast %166 : vector<8x1xf32> to vector<8x8xf32>
    %168 = arith.subf %164, %167 : vector<8x8xf32>
    %169 = math.exp %168 : vector<8x8xf32>
    %cst_91 = arith.constant dense<0.000000e+00> : vector<8xf32>
    %170 = vector.multi_reduction <add>, %169, %cst_91 [1] : vector<8x8xf32> to vector<8xf32>
    %171 = vector.shape_cast %170 : vector<8xf32> to vector<8x1xf32>
    %172 = tpu.reciprocal %171 {approx = true} : vector<8x1xf32> -> vector<8x1xf32>
    %173 = vector.broadcast %172 : vector<8x1xf32> to vector<8x8xf32>
    %174 = arith.mulf %169, %173 : vector<8x8xf32>
    %cst_92 = arith.constant dense<0.000000e+00> : vector<8x8xf32>
    %175 = tpu.matmul %174, %163, %cst_92 {dimension_numbers = #tpu.dot_dimension_numbers<[1], [0], [0], [1], [0, 0, 1, 1], [], []>} : vector<8x8xf32>, vector<8x8xf32>, vector<8x8xf32> -> vector<8x8xf32>
    %c3_93 = arith.constant 3 : index
    %c0_94 = arith.constant 0 : index
    %c0_95 = arith.constant 0 : index
    %176 = vector.load %arg4[%c3_93, %c0_94, %c0_95] : memref<4x8x32xf32, #tpu.memory_space<vmem>>, vector<1x8x32xf32>
    %177 = vector.shape_cast %176 : vector<1x8x32xf32> to vector<8x32xf32>
    %cst_96 = arith.constant dense<0.000000e+00> : vector<8x32xf32>
    %178 = tpu.matmul %175, %177, %cst_96 {dimension_numbers = #tpu.dot_dimension_numbers<[1], [0], [0], [1], [0, 0, 1, 1], [], []>} : vector<8x8xf32>, vector<8x32xf32>, vector<8x32xf32> -> vector<8x32xf32>
    %179 = arith.addf %160, %178 : vector<8x32xf32>
    %c8 = arith.constant 8 : index
    %c0_97 = arith.constant 0 : index
    %180 = vector.load %arg5[%c8, %c0_97] : memref<16x32xf32, #tpu.memory_space<vmem>>, vector<8x32xf32>
    tpu.vector_store %arg5[%c8, %c0_97], %179 {strides = array<i32>} : memref<16x32xf32, #tpu.memory_space<vmem>>, vector<8x32xf32>,
    return
  }
}

</mosaic_0001>

<bundles_post_ra>
// kernel: tpu_custom_call.1
= control target key start
LH: loop header
LB: loop body
LE: loop exit
PB: predicated region body
PF: predicated region fallthrough
CT: control target
= control target key end

     0   :  { %vm27_vm0 = vcmask 261120   ;;  %s3347_s0 = inlined_call_operand.vmem [shape: f32[16,32], index: 0, kind: input, shape index: {}]   ;;  %s3348_s1 = inlined_call_operand.vmem [shape: f32[4,32,8], index: 1, kind: input, shape index: {}]   ;;  %s3349_s2 = inlined_call_operand.vmem [shape: f32[2,32,8], index: 2, kind: input, shape index: {}]   ;;  %s3350_s3 = inlined_call_operand.vmem [shape: f32[2,32,8], index: 3, kind: input, shape index: {}]   ;;  %s3351_s4 = inlined_call_operand.vmem [shape: f32[4,8,32], index: 4, kind: input, shape index: {}]   ;;  %s3352_s5 = inlined_call_operand.hbm [shape: f32[16,32], index: 5, kind: output, shape index: {}]  }
   0x1   :  { %v26_v0 = vld [vmem:[%s3348_s1 + $0x18] sm:$0xff]  ;;  %v25_v1 = vld [vmem:[%s3348_s1 + $0x10] sm:$0xff]  ;;  %v3034_v2 = vld [vmem:[%s3347_s0] sm:$0xff] }
   0x2   :  { %2723 = vmatprep.subr.mxu0 %v26_v0  ;;  %v24_v3 = vld [vmem:[%s3348_s1 + $0x8] sm:$0xff]  ;;  %2731 = vmatprep.mubr.msk.f32.mxu0 %vm27_vm0, %v3034_v2  ;;  %v23_v4 = vld [vmem:[%s3348_s1] sm:$0xff]  ;;  %v2558_v5 = vld [vmem:[%s3348_s1 + $0x38] sm:$0xff] }
   0x3   :  { %2724 = vmatpush3.msra.mxu0 %v26_v0  ;;  %2742 = vmatprep.mubr.msk.f32.mxu1 %vm27_vm0, %v3034_v2  ;;  %v2557_v6 = vld [vmem:[%s3348_s1 + $0x30] sm:$0xff]  ;;  %v3055_v7 = vld [vmem:[%s3347_s0 + $0x8] sm:$0xff]  ;;  %v2564_v8 = vld [vmem:[%s3348_s1 + $0x58] sm:$0xff] }
   0x4   :  { %2725 = vmatprep.subr.mxu0 %v25_v1  ;;  %2734 = vmatprep.subr.mxu1 %v2558_v5 }
   0x5   :  { %2726 = vmatpush3.msra.mxu0 %v25_v1  ;;  %2735 = vmatpush3.msra.mxu1 %v2558_v5 }
   0x6   :  { %2727 = vmatprep.subr.mxu0 %v24_v3 }
   0x7   :  { %2728 = vmatpush3.msra.mxu0 %v24_v3 }
   0x8   :  { %10 = vsyncpa [#allocation3], 0  ;;  %2729 = vmatprep.subr.mxu0 %v23_v4  ;;  %2736 = vmatprep.subr.mxu1 %v2557_v6  ;;  %v2563_v9 = vld [vmem:[%s3348_s1 + $0x50] sm:$0xff]  ;;  %v2556_v10 = vld [vmem:[%s3348_s1 + $0x28] sm:$0xff]  ;;  %v2990_v22 = vmov 0.0   ;;  %vm2991_vm1 = vmmov 0  }
   0x9   :  { %2730 = vmatpush3.msra.mxu0 %v23_v4  ;;  %2737 = vmatpush3.msra.mxu1 %v2557_v6  ;;  %v2562_v11 = vld [vmem:[%s3348_s1 + $0x48] sm:$0xff]  ;;  %v2555_v12 = vld [vmem:[%s3348_s1 + $0x20] sm:$0xff]  ;;  %v352_v14 = vld [vmem:[%s3349_s2 + $0x18] sm:$0xff]  ;;  %vm667_vm2 = vcmask 64512  }
   0xa   :  { %2732 = vmatmul.mubr.msk.f32.vlgmr.msra.gmra.mxu0 %vm27_vm0, %v3055_v7  ;;  %2745 = vmatprep.subr.mxu0 %v2564_v8  ;;  %v2561_v13 = vld [vmem:[%s3348_s1 + $0x40] sm:$0xff]  ;;  %v351_v15 = vld [vmem:[%s3349_s2 + $0x10] sm:$0xff]  ;;  %v350_v16 = vld [vmem:[%s3349_s2 + $0x8] sm:$0xff] }
   0xb   :  { %2746 = vmatpush3.msra.mxu0 %v2564_v8  ;;  %2753 = vmatprep.mubr.msk.f32.mxu0 %vm27_vm0, %v3034_v2  ;;  %v349_v17 = vld [vmem:[%s3349_s2] sm:$0xff]  ;;  %v511_v18 = vld [vmem:[%s3350_s3 + $0x18] sm:$0xff]  ;;  %v510_v19 = vld [vmem:[%s3350_s3 + $0x10] sm:$0xff] }
   0xc   :  { %2747 = vmatprep.subr.mxu0 %v2563_v9  ;;  %2738 = vmatprep.subr.mxu1 %v2556_v10  ;;  %v509_v20 = vld [vmem:[%s3350_s3 + $0x8] sm:$0xff]  ;;  %v508_v21 = vld [vmem:[%s3350_s3] sm:$0xff]  ;;  %v2570_v23 = vld [vmem:[%s3348_s1 + $0x78] sm:$0xff] }
   0xd   :  { %2748 = vmatpush3.msra.mxu0 %v2563_v9  ;;  %2739 = vmatpush3.msra.mxu1 %v2556_v10  ;;  %v2569_v24 = vld [vmem:[%s3348_s1 + $0x70] sm:$0xff]  ;;  %v2568_v25 = vld [vmem:[%s3348_s1 + $0x68] sm:$0xff]  ;;  %v2567_v26 = vld [vmem:[%s3348_s1 + $0x60] sm:$0xff] }
   0xe   :  { %2749 = vmatprep.subr.mxu0 %v2562_v11  ;;  %2740 = vmatprep.subr.mxu1 %v2555_v12  ;;  %v2578_v27 = vld [vmem:[%s3349_s2 + $0x38] sm:$0xff]  ;;  %v2577_v28 = vld [vmem:[%s3349_s2 + $0x30] sm:$0xff]  ;;  %v2576_v29 = vld [vmem:[%s3349_s2 + $0x28] sm:$0xff] }
   0xf   :  { %2750 = vmatpush3.msra.mxu0 %v2562_v11  ;;  %2741 = vmatpush3.msra.mxu1 %v2555_v12  ;;  %v2575_v30 = vld [vmem:[%s3349_s2 + $0x20] sm:$0xff]  ;;  %v2586_v31 = vld [vmem:[%s3350_s3 + $0x38] sm:$0xff]  ;;  %v2585_v32 = vld [vmem:[%s3350_s3 + $0x30] sm:$0xff] }
  0x10   :  { %2751 = vmatprep.subr.mxu0 %v2561_v13  ;;  %2743 = vmatmul.mubr.msk.f32.vlgmr.msra.gmra.mxu1 %vm27_vm0, %v3055_v7  ;;  %v2584_v33 = vld [vmem:[%s3350_s3 + $0x28] sm:$0xff]  ;;  %v2583_v34 = vld [vmem:[%s3350_s3 + $0x20] sm:$0xff] }
  0x11   :  { %2752 = vmatpush3.msra.mxu0 %v2561_v13  ;;  %2764 = vmatprep.mubr.msk.f32.mxu1 %vm27_vm0, %v3034_v2  ;;  %v3203_v3 = vld [vmem:[%s3351_s4] sm:$0xff]  ;;  %v3213_v4 = vld [vmem:[%s3351_s4 + $0x8] sm:$0xff] }
  0x12   :  { %2754 = vmatmul.mubr.msk.f32.vlgmr.msra.gmra.mxu0 %vm27_vm0, %v3055_v7  ;;  %2767 = vmatprep.subr.mxu0 %v352_v14 }
  0x13   :  { %2768 = vmatpush3.msra.mxu0 %v352_v14  ;;  %2775 = vmatprep.mubr.msk.f32.mxu0 %vm27_vm0, %v3034_v2 }
  0x14   :  { %2769 = vmatprep.subr.mxu0 %v351_v15  ;;  %2756 = vmatprep.subr.mxu1 %v2570_v23 }
  0x15   :  { %2770 = vmatpush3.msra.mxu0 %v351_v15  ;;  %2757 = vmatpush3.msra.mxu1 %v2570_v23 }
  0x16   :  { %2771 = vmatprep.subr.mxu0 %v350_v16  ;;  %2758 = vmatprep.subr.mxu1 %v2569_v24 }
  0x17   :  { %2772 = vmatpush3.msra.mxu0 %v350_v16  ;;  %2759 = vmatpush3.msra.mxu1 %v2569_v24 }
  0x18   :  { %2773 = vmatprep.subr.mxu0 %v349_v17  ;;  %2760 = vmatprep.subr.mxu1 %v2568_v25 }
  0x19   :  { %2774 = vmatpush3.msra.mxu0 %v349_v17  ;;  %2761 = vmatpush3.msra.mxu1 %v2568_v25 }
  0x1a   :  { %2776 = vmatmul.mubr.msk.f32.vlgmr.msra.gmra.mxu0 %vm27_vm0, %v3055_v7  ;;  %2789 = vmatprep.subr.mxu0 %v511_v18 }
  0x1b   :  { %2797 = vmatprep.mubr.msk.f32.mxu0 %vm27_vm0, %v3034_v2  ;;  %2790 = vmatpush3.msra.mxu0 %v511_v18 }
  0x1c   :  { %2791 = vmatprep.subr.mxu0 %v510_v19  ;;  %2762 = vmatprep.subr.mxu1 %v2567_v26 }
  0x1d   :  { %2792 = vmatpush3.msra.mxu0 %v510_v19  ;;  %2763 = vmatpush3.msra.mxu1 %v2567_v26 }
  0x1e   :  { %2793 = vmatprep.subr.mxu0 %v509_v20  ;;  %2778 = vmatprep.subr.mxu1 %v2578_v27 }
  0x1f   :  { %2794 = vmatpush3.msra.mxu0 %v509_v20  ;;  %2765 = vmatmul.mubr.msk.f32.vlgmr.msra.gmra.mxu1 %vm27_vm0, %v3055_v7 }
  0x20   :  { %2795 = vmatprep.subr.mxu0 %v508_v21  ;;  %2779 = vmatpush3.msra.mxu1 %v2578_v27 }
  0x21   :  { %2796 = vmatpush3.msra.mxu0 %v508_v21  ;;  %2786 = vmatprep.mubr.msk.f32.mxu1 %vm27_vm0, %v3034_v2 }
  0x22   :  { %2798 = vmatmul.mubr.msk.f32.vlgmr.msra.gmra.mxu0 %vm27_vm0, %v3055_v7  ;;  %2811 = vmatprep.subr.mxu0 %v2990_v22 }
  0x23   :  { %2813 = vmatprep.mubr.msk.f32.mxu0 %vm2991_vm1, %v2990_v22  ;;  %2780 = vmatprep.subr.mxu1 %v2577_v28 }
  0x24   :  { %2781 = vmatpush3.msra.mxu1 %v2577_v28 }
  0x25   :  { %2782 = vmatprep.subr.mxu1 %v2576_v29 }
  0x26   :  { %2783 = vmatpush3.msra.mxu1 %v2576_v29  ;;  %v3241_v29 = vld [vmem:[%s3351_s4 + $0x10] sm:$0xff] }
  0x27   :  { %2784 = vmatprep.subr.mxu1 %v2575_v30 }
  0x28   :  { %2785 = vmatpush3.msra.mxu1 %v2575_v30 }
  0x29   :  { %2800 = vmatprep.subr.mxu1 %v2586_v31  ;;  %2787 = vmatmul.mubr.msk.f32.vlgmr.msra.gmra.mxu1 %vm27_vm0, %v3055_v7 }
  0x2a   :  { %2801 = vmatpush3.msra.mxu1 %v2586_v31  ;;  %2808 = vmatprep.mubr.msk.f32.mxu1 %vm27_vm0, %v3034_v2 }
  0x2b   :  { %2802 = vmatprep.subr.mxu1 %v2585_v32 }
  0x2c   :  { %2803 = vmatpush3.msra.mxu1 %v2585_v32 }
  0x2d   :  { %2804 = vmatprep.subr.mxu1 %v2584_v33 }
  0x2e   :  { %2805 = vmatpush3.msra.mxu1 %v2584_v33 }
  0x2f   :  { %2806 = vmatprep.subr.mxu1 %v2583_v34 }
  0x30   :  { %2807 = vmatpush3.msra.mxu1 %v2583_v34 }
  0x31   :  { %2816 = vmatprep.subr.mxu1 %v2990_v22  ;;  %2809 = vmatmul.mubr.msk.f32.vlgmr.msra.gmra.mxu1 %vm27_vm0, %v3055_v7 }
  0x32   :  { %2818 = vmatprep.mubr.msk.f32.mxu1 %vm2991_vm1, %v2990_v22 }
  0xca   :  { %v3169_v35 = vpop.f32.mrf.mxu0 }
  0xcc   :  { %v100_v36 = vpop.f32.mrf.mxu0 }
  0xd0   :  { %v3179_v41 = vpop.f32.mrf.mxu1 }
  0xd2   :  { %v3171_v37 = vpop.f32.mrf.mxu0  ;;  %v180_v42 = vpop.f32.mrf.mxu1 }
  0xd4   :  { %v3173_v38 = vpop.f32.mrf.mxu0 }
  0xda   :  { %v3175_v39 = vpop.f32.mrf.mxu0 }
  0xdc   :  { %v419_v40 = vpop.f32.mrf.mxu0 }
  0xdd   :  { %2812 = vmatpush3.xpose.msk.msra.mxu0 %vm667_vm2, %v419_v40 }
  0xde   :  { %2821 = vmatprep.subr.mxu0 %v2990_v22 }
  0xdf   :  { %v3217_v5 = vpop.f32.mrf.mxu1 }
  0xe0   :  { %2814 = vmatmul.mubr.msk.f32.vlgmr.msra.gmra.mxu0 %vm667_vm2, %v100_v36 }
  0xe1   :  { %2822 = vmatpush3.xpose.msk.msra.mxu0 %vm667_vm2, %v419_v40  ;;  %2823 = vmatprep.mubr.msk.f32.mxu0 %vm2991_vm1, %v2990_v22  ;;  %v340_v6 = vpop.f32.mrf.mxu1 }
  0xe2   :  { %2831 = vmatprep.subr.mxu0 %v2990_v22  ;;  %v3189_v43 = vpop.f32.mrf.mxu0 }
  0xe4   :  { %2824 = vmatmul.mubr.msk.f32.vlgmr.msra.gmra.mxu0 %vm667_vm2, %v180_v42  ;;  %v578_v44 = vpop.f32.mrf.mxu0 }
  0xe5   :  { %2833 = vmatprep.mubr.msk.f32.mxu0 %vm2991_vm1, %v2990_v22  ;;  %2817 = vmatpush3.msra.mxu1 %v578_v44 }
  0xe6   :  { %2826 = vmatprep.subr.mxu1 %v2990_v22  ;;  %2832 = vmatpush3.msra.mxu0 %v3213_v4 }
  0xe7   :  { %2841 = vmatprep.subr.mxu0 %v2990_v22 }
  0xe9   :  { %v3219_v7 = vpop.f32.mrf.mxu1 }
  0xeb   :  { %v499_v8 = vpop.f32.mrf.mxu1 }
  0xf1   :  { %v3221_v9 = vpop.f32.mrf.mxu1 }
  0xf3   :  { %v658_v10 = vpop.f32.mrf.mxu1 }
 0x1a0   :  { %v740_v45 = vpop.f32.mrf.mxu0 }
 0x1a1   :  { %v744_v46 = vsel %vm667_vm2, %v740_v45, -inf }
 0x1a2   :  { %745 = vmax.xlane.f32.xlu0 %v744_v46  ;;  %v2815_v47 = vpop.f32.mrf.mxu0 }
 0x1a4   :  { %v898_v48 = vpop.f32.mrf.mxu0 }
 0x1a5   :  { %v902_v49 = vsel %vm667_vm2, %v898_v48, -inf }
 0x1a6   :  { %903 = vmax.xlane.f32.xlu0 %v902_v49  ;;  %v2825_v50 = vpop.f32.mrf.mxu0 }
 0x22b   :  { %v746_v51 = vpop.xlane.xlu0 %745 }
 0x22c   :  { %v747_v52 = vsub.f32 %v740_v45, %v746_v51  ;;  %v3262_v51 = vld [vmem:[%s3351_s4 + $0x18] sm:$0xff]  ;;  %s2992_s4 = smov [#allocation2]  }
 0x22d   :  { %s2542_s14 = sshll.u32 %s2992_s4, 4  ;;  %s2543_s14 = int_to_ptr.vmem [resolvable:$true] %s2542_s14 }
 0x22e   :  { %v748_v53 = vmul.f32 1.442695, %v747_v52  ;;  %s2968_s0 = scalar_lea.vmem %s2543_s14, 256  ;;  %p2973_p1 = scmp.lt.s32.totalorder %s2543_s14, %s2543_s14 }
 0x22f   :  { %v904_v54 = vpop.xlane.xlu0 %903  ;;  %p2969_p0 = scmp.ne.s32.totalorder %s2543_s14, %s2968_s0  ;;  %p2974_p2 = scmp.lt.s32.totalorder %s2968_s0, %s2968_s0 }
 0x230   :  { %2936 = vpow2.f32 %v748_v53  ;;  %v905_v55 = vsub.f32 %v898_v48, %v904_v54 }
 0x231   :  { %p2975_p3 = por %p2974_p2, %p2973_p1 }
 0x232   :  { %v906_v56 = vmul.f32 1.442695, %v905_v55 }
 0x233   :  { %p2976_p4 = pnand %p2975_p3, %p2969_p0 }
 0x234   :  { %2938 = vpow2.f32 %v906_v56 }
 0x23d   :  { %v2937_v57 = vpop.eup %2936 }
 0x23e   :  { %v750_v58 = vsel %vm667_vm2, %v2937_v57, 0.0 }
 0x23f   :  { %751 = vadd.xlane.f32.xlu1 %v750_v58 }
 0x241   :  { %v2939_v59 = vpop.eup %2938 }
 0x242   :  { %v908_v60 = vsel %vm667_vm2, %v2939_v59, 0.0 }
 0x243   :  { %909 = vadd.xlane.f32.xlu1 %v908_v60 }
 0x2c8   :  { %v752_v61 = vpop.xlane.xlu1 %751 }
 0x2c9   :  { %2940 = vrcp.f32 %v752_v61 }
 0x2cc   :  { %v910_v62 = vpop.xlane.xlu1 %909 }
 0x2cd   :  { %2942 = vrcp.f32 %v910_v62 }
 0x2d6   :  { %v2941_v63 = vpop.eup %2940 }
 0x2d7   :  { %v754_v0 = vmul.f32 %v2941_v63, %v2937_v57 }
 0x2d9   :  { %2819 = vmatmul.mubr.msk.f32.vlgmr.msra.gmra.mxu1 %vm667_vm2, %v754_v0 }
 0x2da   :  { %v2943_v1 = vpop.eup %2942  ;;  %2827 = vmatpush3.msra.mxu1 %v578_v44  ;;  %2828 = vmatprep.mubr.msk.f32.mxu1 %vm2991_vm1, %v2990_v22 }
 0x2db   :  { %v912_v2 = vmul.f32 %v2943_v1, %v2939_v59  ;;  %2836 = vmatprep.subr.mxu1 %v2990_v22 }
 0x2dd   :  { %2829 = vmatmul.mubr.msk.f32.vlgmr.msra.gmra.mxu1 %vm667_vm2, %v912_v2 }
 0x2de   :  { %2837 = vmatpush3.msra.mxu1 %v3203_v3  ;;  %2838 = vmatprep.mubr.msk.f32.mxu1 %vm2991_vm1, %v2990_v22 }
 0x2df   :  { %2846 = vmatprep.subr.mxu1 %v2990_v22 }
 0x399   :  { %v824_v11 = vpop.f32.mrf.mxu1 }
 0x39a   :  { %2839 = vmatmul.mubr.msk.f32.vlgmr.msra.gmra.mxu1 %vm667_vm2, %v824_v11 }
 0x39b   :  { %2847 = vmatpush3.msra.mxu1 %v658_v10  ;;  %v2820_v12 = vpop.f32.mrf.mxu1  ;;  %2848 = vmatprep.mubr.msk.f32.mxu1 %vm2991_vm1, %v2990_v22 }
 0x39c   :  { %2856 = vmatprep.subr.mxu1 %v2990_v22 }
 0x39d   :  { %v982_v13 = vpop.f32.mrf.mxu1 }
 0x39e   :  { %2834 = vmatmul.mubr.msk.f32.vlgmr.msra.gmra.mxu0 %vm667_vm2, %v982_v13 }
 0x39f   :  { %2842 = vmatpush3.xpose.msk.msra.mxu0 %vm667_vm2, %v499_v8  ;;  %v2830_v14 = vpop.f32.mrf.mxu1  ;;  %2843 = vmatprep.mubr.msk.f32.mxu0 %vm2991_vm1, %v2990_v22 }
 0x3a0   :  { %2851 = vmatprep.subr.mxu0 %v2990_v22 }
 0x3a2   :  { %2844 = vmatmul.mubr.msk.f32.vlgmr.msra.gmra.mxu0 %vm667_vm2, %v3173_v38 }
 0x3a3   :  { %2853 = vmatprep.mubr.msk.f32.mxu0 %vm2991_vm1, %v2990_v22  ;;  %2852 = vmatpush3.msra.mxu0 %v3241_v29 }
 0x3a4   :  { %2861 = vmatprep.subr.mxu0 %v2990_v22 }
 0x45a   :  { %v1130_v15 = vpop.f32.mrf.mxu1 }
 0x45c   :  { %v2840_v16 = vpop.f32.mrf.mxu1 }
 0x45e   :  { %v1057_v17 = vpop.f32.mrf.mxu0 }
 0x45f   :  { %v1131_v18 = vadd.f32 %v1130_v15, %v1057_v17 }
 0x460   :  { %v2835_v19 = vpop.f32.mrf.mxu0 }
 0x462   :  { %v1206_v20 = vpop.f32.mrf.mxu0 }
 0x463   :  { %v1210_v21 = vsel %vm667_vm2, %v1206_v20, -inf }
 0x464   :  { %1211 = vmax.xlane.f32.xlu0 %v1210_v21  ;;  %v2845_v23 = vpop.f32.mrf.mxu0 }
 0x4ed   :  { %v1212_v24 = vpop.xlane.xlu0 %1211 }
 0x4ee   :  { %v1213_v25 = vsub.f32 %v1206_v20, %v1212_v24 }
 0x4f0   :  { %v1214_v26 = vmul.f32 1.442695, %v1213_v25 }
 0x4f2   :  { %2944 = vpow2.f32 %v1214_v26 }
 0x4ff   :  { %v2945_v27 = vpop.eup %2944 }
 0x500   :  { %v1216_v28 = vsel %vm667_vm2, %v2945_v27, 0.0 }
 0x501   :  { %1217 = vadd.xlane.f32.xlu1 %v1216_v28 }
 0x58a   :  { %v1218_v30 = vpop.xlane.xlu1 %1217 }
 0x58b   :  { %2946 = vrcp.f32 %v1218_v30 }
 0x598   :  { %v2947_v31 = vpop.eup %2946 }
 0x599   :  { %v1220_v32 = vmul.f32 %v2947_v31, %v2945_v27 }
 0x59b   :  { %2849 = vmatmul.mubr.msk.f32.vlgmr.msra.gmra.mxu1 %vm667_vm2, %v1220_v32 }
 0x59c   :  { %2857 = vmatpush3.xpose.msk.msra.mxu1 %vm667_vm2, %v499_v8  ;;  %2858 = vmatprep.mubr.msk.f32.mxu1 %vm2991_vm1, %v2990_v22 }
 0x59d   :  { %2866 = vmatprep.subr.mxu1 %v2990_v22 }
 0x59f   :  { %2859 = vmatmul.mubr.msk.f32.vlgmr.msra.gmra.mxu1 %vm667_vm2, %v340_v6 }
 0x5a0   :  { %2868 = vmatprep.mubr.msk.f32.mxu1 %vm2991_vm1, %v2990_v22  ;;  %2867 = vmatpush3.msra.mxu1 %v3262_v51 }
 0x5a1   :  { %2876 = vmatprep.subr.mxu1 %v2990_v22 }
 0x65b   :  { %v1290_v33 = vpop.f32.mrf.mxu1 }
 0x65c   :  { %2854 = vmatmul.mubr.msk.f32.vlgmr.msra.gmra.mxu0 %vm667_vm2, %v1290_v33 }
 0x65d   :  { %2862 = vmatpush3.msra.mxu0 %v658_v10  ;;  %v2850_v34 = vpop.f32.mrf.mxu1  ;;  %2863 = vmatprep.mubr.msk.f32.mxu0 %vm2991_vm1, %v2990_v22 }
 0x65e   :  { %2871 = vmatprep.subr.mxu0 %v2990_v22 }
 0x65f   :  { %v1439_v36 = vpop.f32.mrf.mxu1 }
 0x660   :  { %v1443_v38 = vsel %vm667_vm2, %v1439_v36, -inf }
 0x661   :  { %1444 = vmax.xlane.f32.xlu0 %v1443_v38  ;;  %v2860_v40 = vpop.f32.mrf.mxu1 }
 0x6ea   :  { %v1445_v42 = vpop.xlane.xlu0 %1444 }
 0x6eb   :  { %v1446_v44 = vsub.f32 %v1439_v36, %v1445_v42 }
 0x6ed   :  { %v1447_v45 = vmul.f32 1.442695, %v1446_v44 }
 0x6ef   :  { %2948 = vpow2.f32 %v1447_v45 }
 0x6fc   :  { %v2949_v46 = vpop.eup %2948 }
 0x6fd   :  { %v1449_v47 = vsel %vm667_vm2, %v2949_v46, 0.0 }
 0x6fe   :  { %1450 = vadd.xlane.f32.xlu1 %v1449_v47 }
 0x71c   :  { %v1365_v48 = vpop.f32.mrf.mxu0 }
 0x71d   :  { %v1369_v49 = vadd.f32 %v1365_v48, %v1131_v18 }
 0x71e   :  { %v2855_v50 = vpop.f32.mrf.mxu0 }
 0x787   :  { %v1451_v52 = vpop.xlane.xlu1 %1450 }
 0x788   :  { %2950 = vrcp.f32 %v1451_v52 }
 0x795   :  { %v2951_v53 = vpop.eup %2950 }
 0x796   :  { %v1453_v54 = vmul.f32 %v2951_v53, %v2949_v46 }
 0x798   :  { %2864 = vmatmul.mubr.msk.f32.vlgmr.msra.gmra.mxu0 %vm667_vm2, %v1453_v54 }
 0x799   :  { %2872 = vmatpush3.xpose.msk.msra.mxu0 %vm667_vm2, %v3175_v39  ;;  %2873 = vmatprep.mubr.msk.f32.mxu0 %vm2991_vm1, %v2990_v22 }
 0x79a   :  { %2881 = vmatprep.subr.mxu0 %v2990_v22 }
 0x79c   :  { %2874 = vmatmul.mubr.msk.f32.vlgmr.msra.gmra.mxu0 %vm667_vm2, %v3169_v35 }
 0x79d   :  { %2882 = vmatpush3.xpose.msk.msra.mxu0 %vm667_vm2, %v3175_v39  ;;  %2883 = vmatprep.mubr.msk.f32.mxu0 %vm2991_vm1, %v2990_v22 }
 0x79e   :  { %2891 = vmatprep.subr.mxu0 %v2990_v22 }
 0x7a0   :  { %2884 = vmatmul.mubr.msk.f32.vlgmr.msra.gmra.mxu0 %vm667_vm2, %v3179_v41 }
 0x7a1   :  { %2892 = vmatpush3.msra.mxu0 %v3213_v4  ;;  %2893 = vmatprep.mubr.msk.f32.mxu0 %vm2991_vm1, %v2990_v22 }
 0x7a2   :  { %2901 = vmatprep.subr.mxu0 %v2990_v22 }
 0x858   :  { %v1523_v55 = vpop.f32.mrf.mxu0 }
 0x859   :  { %2869 = vmatmul.mubr.msk.f32.vlgmr.msra.gmra.mxu1 %vm667_vm2, %v1523_v55 }
 0x85a   :  { %2877 = vmatpush3.msra.mxu1 %v3189_v43  ;;  %v2865_v35 = vpop.f32.mrf.mxu0  ;;  %2878 = vmatprep.mubr.msk.f32.mxu1 %vm2991_vm1, %v2990_v22 }
 0x85b   :  { %2886 = vmatprep.subr.mxu1 %v2990_v22 }
 0x85c   :  { %v1676_v39 = vpop.f32.mrf.mxu0 }
 0x85d   :  { %v1680_v41 = vsel %vm667_vm2, %v1676_v39, -inf }
 0x85e   :  { %1681 = vmax.xlane.f32.xlu0 %v1680_v41  ;;  %v2875_v56 = vpop.f32.mrf.mxu0 }
 0x860   :  { %v1834_v57 = vpop.f32.mrf.mxu0 }
 0x861   :  { %v1838_v58 = vsel %vm667_vm2, %v1834_v57, -inf }
 0x862   :  { %1839 = vmax.xlane.f32.xlu1 %v1838_v58  ;;  %v2885_v59 = vpop.f32.mrf.mxu0 }
 0x8e7   :  { %v1682_v60 = vpop.xlane.xlu0 %1681 }
 0x8e8   :  { %v1683_v61 = vsub.f32 %v1676_v39, %v1682_v60 }
 0x8ea   :  { %v1684_v62 = vmul.f32 1.442695, %v1683_v61 }
 0x8eb   :  { %v1840_v63 = vpop.xlane.xlu1 %1839 }
 0x8ec   :  { %2952 = vpow2.f32 %v1684_v62  ;;  %v1841_v0 = vsub.f32 %v1834_v57, %v1840_v63 }
 0x8ee   :  { %v1842_v1 = vmul.f32 1.442695, %v1841_v0 }
 0x8f0   :  { %2954 = vpow2.f32 %v1842_v1 }
 0x8f9   :  { %v2953_v2 = vpop.eup %2952 }
 0x8fa   :  { %v1686_v4 = vsel %vm667_vm2, %v2953_v2, 0.0 }
 0x8fb   :  { %1687 = vadd.xlane.f32.xlu0 %v1686_v4 }
 0x8fd   :  { %v2955_v6 = vpop.eup %2954 }
 0x8fe   :  { %v1844_v8 = vsel %vm667_vm2, %v2955_v6, 0.0 }
 0x8ff   :  { %1845 = vadd.xlane.f32.xlu1 %v1844_v8 }
 0x919   :  { %v1598_v10 = vpop.f32.mrf.mxu1 }
 0x91a   :  { %v1602_v11 = vadd.f32 %v1598_v10, %v1369_v49 }
 0x91b   :  { %v2870_v12 = vpop.f32.mrf.mxu1 }
 0x91c   :  { %1603 = vst.msk [vmem:[#allocation2] sm:$0xff] %vm27_vm0, %v1602_v11 }
 0x984   :  { %v1688_v13 = vpop.xlane.xlu0 %1687 }
 0x985   :  { %2956 = vrcp.f32 %v1688_v13 }
 0x988   :  { %v1846_v14 = vpop.xlane.xlu1 %1845 }
 0x989   :  { %2958 = vrcp.f32 %v1846_v14 }
 0x992   :  { %v2957_v15 = vpop.eup %2956 }
 0x993   :  { %v1690_v16 = vmul.f32 %v2957_v15, %v2953_v2 }
 0x995   :  { %2879 = vmatmul.mubr.msk.f32.vlgmr.msra.gmra.mxu1 %vm667_vm2, %v1690_v16 }
 0x996   :  { %v2959_v17 = vpop.eup %2958  ;;  %2887 = vmatpush3.msra.mxu1 %v3189_v43  ;;  %2888 = vmatprep.mubr.msk.f32.mxu1 %vm2991_vm1, %v2990_v22 }
 0x997   :  { %v1848_v18 = vmul.f32 %v2959_v17, %v2955_v6  ;;  %2896 = vmatprep.subr.mxu1 %v2990_v22 }
 0x999   :  { %2889 = vmatmul.mubr.msk.f32.vlgmr.msra.gmra.mxu1 %vm667_vm2, %v1848_v18 }
 0x99a   :  { %2897 = vmatpush3.msra.mxu1 %v3203_v3  ;;  %2898 = vmatprep.mubr.msk.f32.mxu1 %vm2991_vm1, %v2990_v22 }
 0x99b   :  { %2906 = vmatprep.subr.mxu1 %v2990_v22 }
 0xa55   :  { %v1760_v19 = vpop.f32.mrf.mxu1 }
 0xa56   :  { %2899 = vmatmul.mubr.msk.f32.vlgmr.msra.gmra.mxu1 %vm667_vm2, %v1760_v19 }
 0xa57   :  { %2907 = vmatpush3.msra.mxu1 %v3221_v9  ;;  %v2880_v43 = vpop.f32.mrf.mxu1  ;;  %2908 = vmatprep.mubr.msk.f32.mxu1 %vm2991_vm1, %v2990_v22 }
 0xa58   :  { %2916 = vmatprep.subr.mxu1 %v2990_v22 }
 0xa59   :  { %v1918_v20 = vpop.f32.mrf.mxu1 }
 0xa5a   :  { %2894 = vmatmul.mubr.msk.f32.vlgmr.msra.gmra.mxu0 %vm667_vm2, %v1918_v20 }
 0xa5b   :  { %2902 = vmatpush3.xpose.msk.msra.mxu0 %vm667_vm2, %v3219_v7  ;;  %v2890_v3 = vpop.f32.mrf.mxu1  ;;  %2903 = vmatprep.mubr.msk.f32.mxu0 %vm2991_vm1, %v2990_v22 }
 0xa5c   :  { %2911 = vmatprep.subr.mxu0 %v2990_v22 }
 0xa5e   :  { %2904 = vmatmul.mubr.msk.f32.vlgmr.msra.gmra.mxu0 %vm667_vm2, %v3171_v37 }
 0xa5f   :  { %2912 = vmatpush3.msra.mxu0 %v3241_v29  ;;  %2913 = vmatprep.mubr.msk.f32.mxu0 %vm2991_vm1, %v2990_v22 }
 0xa60   :  { %2921 = vmatprep.subr.mxu0 %v2990_v22 }
 0xb16   :  { %v2065_v21 = vpop.f32.mrf.mxu1 }
 0xb18   :  { %v2900_v23 = vpop.f32.mrf.mxu1 }
 0xb1a   :  { %v1992_v24 = vpop.f32.mrf.mxu0 }
 0xb1b   :  { %v2066_v25 = vadd.f32 %v2065_v21, %v1992_v24 }
 0xb1c   :  { %v2895_v26 = vpop.f32.mrf.mxu0 }
 0xb1e   :  { %v2141_v27 = vpop.f32.mrf.mxu0 }
 0xb1f   :  { %v2145_v28 = vsel %vm667_vm2, %v2141_v27, -inf }
 0xb20   :  { %2146 = vmax.xlane.f32.xlu0 %v2145_v28  ;;  %v2905_v30 = vpop.f32.mrf.mxu0 }
 0xba9   :  { %v2147_v31 = vpop.xlane.xlu0 %2146 }
 0xbaa   :  { %v2148_v32 = vsub.f32 %v2141_v27, %v2147_v31 }
 0xbac   :  { %v2149_v37 = vmul.f32 1.442695, %v2148_v32 }
 0xbae   :  { %2960 = vpow2.f32 %v2149_v37 }
 0xbbb   :  { %v2961_v29 = vpop.eup %2960 }
 0xbbc   :  { %v2151_v33 = vsel %vm667_vm2, %v2961_v29, 0.0 }
 0xbbd   :  { %2152 = vadd.xlane.f32.xlu1 %v2151_v33 }
 0xc46   :  { %v2153_v34 = vpop.xlane.xlu1 %2152 }
 0xc47   :  { %2962 = vrcp.f32 %v2153_v34 }
 0xc54   :  { %v2963_v36 = vpop.eup %2962 }
 0xc55   :  { %v2155_v38 = vmul.f32 %v2963_v36, %v2961_v29 }
 0xc57   :  { %2909 = vmatmul.mubr.msk.f32.vlgmr.msra.gmra.mxu1 %vm667_vm2, %v2155_v38 }
 0xc58   :  { %2917 = vmatpush3.xpose.msk.msra.mxu1 %vm667_vm2, %v3219_v7  ;;  %2918 = vmatprep.mubr.msk.f32.mxu1 %vm2991_vm1, %v2990_v22 }
 0xc59   :  { %2926 = vmatprep.subr.mxu1 %v2990_v22 }
 0xc5b   :  { %2919 = vmatmul.mubr.msk.f32.vlgmr.msra.gmra.mxu1 %vm667_vm2, %v3217_v5 }
 0xc5c   :  { %2927 = vmatpush3.msra.mxu1 %v3262_v51  ;;  %2928 = vmatprep.mubr.msk.f32.mxu1 %vm2991_vm1, %v2990_v22 }
 0xd17   :  { %v2225_v40 = vpop.f32.mrf.mxu1 }
 0xd18   :  { %2914 = vmatmul.mubr.msk.f32.vlgmr.msra.gmra.mxu0 %vm667_vm2, %v2225_v40 }
 0xd19   :  { %2922 = vmatpush3.msra.mxu0 %v3221_v9  ;;  %v2910_v42 = vpop.f32.mrf.mxu1  ;;  %2923 = vmatprep.mubr.msk.f32.mxu0 %vm2991_vm1, %v2990_v22 }
 0xd1b   :  { %v2373_v7 = vpop.f32.mrf.mxu1 }
 0xd1c   :  { %v2377_v44 = vsel %vm667_vm2, %v2373_v7, -inf }
 0xd1d   :  { %2378 = vmax.xlane.f32.xlu0 %v2377_v44  ;;  %v2920_v45 = vpop.f32.mrf.mxu1 }
 0xda6   :  { %v2379_v5 = vpop.xlane.xlu0 %2378 }
 0xda7   :  { %v2380_v46 = vsub.f32 %v2373_v7, %v2379_v5 }
 0xda9   :  { %v2381_v47 = vmul.f32 1.442695, %v2380_v46 }
 0xdab   :  { %2964 = vpow2.f32 %v2381_v47 }
 0xdb8   :  { %v2965_v48 = vpop.eup %2964 }
 0xdb9   :  { %v2383_v49 = vsel %vm667_vm2, %v2965_v48, 0.0 }
 0xdba   :  { %2384 = vadd.xlane.f32.xlu1 %v2383_v49 }
 0xdd8   :  { %v2299_v50 = vpop.f32.mrf.mxu0 }
 0xdd9   :  { %v2303_v51 = vadd.f32 %v2299_v50, %v2066_v25 }
 0xdda   :  { %v2915_v9 = vpop.f32.mrf.mxu0 }
 0xe43   :  { %v2385_v52 = vpop.xlane.xlu1 %2384 }
 0xe44   :  { %2966 = vrcp.f32 %v2385_v52 }
 0xe51   :  { %v2967_v53 = vpop.eup %2966 }
 0xe52   :  { %v2387_v22 = vmul.f32 %v2967_v53, %v2965_v48 }
 0xe54   :  { %2924 = vmatmul.mubr.msk.f32.vlgmr.msra.gmra.mxu0 %vm667_vm2, %v2387_v22 }
 0xf14   :  { %v2457_v54 = vpop.f32.mrf.mxu0 }
 0xf15   :  { %2929 = vmatmul.mubr.msk.f32.vlgmr.msra.gmra.mxu1 %vm667_vm2, %v2457_v54 }
 0xf16   :  { %v2925_v55 = vpop.f32.mrf.mxu0 }
 0xfd5   :  { %v2531_v35 = vpop.f32.mrf.mxu1 }
 0xfd6   :  { %v2535_v39 = vadd.f32 %v2531_v35, %v2303_v51 }
 0xfd7   :  { %v2930_v41 = vpop.f32.mrf.mxu1 }
 0xfd8   :  { %2536 = vst.msk [vmem:[#allocation2 + $0x8] sm:$0xff] %vm27_vm0, %v2535_v39 }
 0xfd9   :  { %2979 = shalt.err (!%p2976_p4)
}
 0xfda   :  { %s2993_s15 = smov 128   ;;  %s2994_s16 = smov 8  }
 0xfdb   :  { %2548 = dma.vmem_to_hbm [thread:$0]  %s2543_s14, 256, %s3352_s5, [#allocation3], %s2993_s15, %s2993_s15, %s2994_s16  }
 0xfdc   :  { %2988 = dma.done.wait [#allocation3], 256  }
 0xfdd   :  { %2989 = vsyncadd [#allocation3], 4294967040 }
 0xfde   :  { %2552 = vsyncpa [#allocation3], 1 }

</bundles_post_ra>
